<compile_context>
chip_gen: v7x
topology: tpu7x:2x2x1
jax: 0.10.0
libtpu: 0.0.40
codegen_flags: <defaults>
</compile_context>

<pallas_src>
import functools

import jax
import jax.numpy as jnp
from jax.experimental import pallas as pl
from jax.experimental.pallas import tpu as pltpu


def _round_up(x, m):
    return (x + m - 1) // m * m


# ------------------------------------------------------------------
# Fused Pallas kernel: ALL FastRGCNConv layers (+ fused ReLU), all relations
# ------------------------------------------------------------------
def _fused_rgcn_kernel(num_layers, num_relations, x_ref, a_ref, dinv_ref, *rest):
    """rest = (w_big_0, bias_0, ..., w_big_{L-1}, bias_{L-1}, out_ref).

    x_ref:    (N, F0)    f32  node features (resident for all layers)
    a_ref:    (R, N, N)  bf16 exact 0/1/2.. multi-edge counts (UNNORMALIZED)
    dinv_ref: (R, N, 1)  f32  1 / max(in-degree, 1) per (relation, dst)
    w_big_l:  (R*F_l + F_l, Hout_l)  row-stacked [W_1; ...; W_R; W_root]
    bias_l:   (1, Hout_l)
    """
    wb_refs = rest[: 2 * num_layers]
    out_ref = rest[2 * num_layers]

    x = x_ref[...]                                              # (N, F0) f32
    for layer in range(num_layers):                             # static unroll (L=2)
        w_ref = wb_refs[2 * layer]
        b_ref = wb_refs[2 * layer + 1]
        # aggregate-then-transform; root/self term folded into the same contraction
        parts = []
        for r in range(num_relations):                          # static unroll (R=4)
            a_r = a_ref[r].astype(jnp.float32)                  # exact 0/1 counts
            m_r = jnp.dot(a_r, x, preferred_element_type=jnp.float32)   # (N, F)
            parts.append(m_r * dinv_ref[r])                     # f32 mean (1/deg) scale
        parts.append(x)                                         # root transform folded in
        m = jnp.concatenate(parts, axis=-1)                     # (N, R*F + F)
        h = jnp.dot(m, w_ref[...], preferred_element_type=jnp.float32) + b_ref[...]
        x = jnp.maximum(h, 0.0)                                 # fused ReLU (GNN act)
    out_ref[...] = x.astype(out_ref.dtype)                      # lane-dense (N, Hp) store


# ------------------------------------------------------------------
# GNN.forward (arch='rgcn', act='relu', norm=None, dropout=0.0)
# ------------------------------------------------------------------
def gnn_forward(node_features, edge_features, edge_flats, params, num_relations):
    """Mirrors GNN.forward for the rgcn arch.  `params` is a list of
    (W_rel (R,Fin,H), W_root (Fin,H), bias (H,)) per layer.
    Returns (node_features, edge_features)."""
    N, F0 = node_features.shape
    R = num_relations
    L = len(params)

    # --- glue (plain JAX): exactly as in GNN.forward ---
    if edge_flats.shape[0] != 2:
        edge_flats = edge_flats.T                               # -> (2, E)
    src, dst = edge_flats[0], edge_flats[1]
    edge_labels = jnp.argmax(
        edge_features[:, : -1 * num_relations], axis=1
    ).astype(jnp.int32)

    # Dense per-relation multi-edge counts (exact small integers -> bf16-exact) and
    # f32 per-(relation, dst) inverse in-degree for FastRGCNConv's mean aggregation.
    # Built ONCE and reused by every layer inside the fused kernel.
    adj = jnp.zeros((R, N, N), jnp.float32).at[edge_labels, dst, src].add(1.0)
    deg = jnp.sum(adj, axis=-1, keepdims=True)                  # (R, N, 1)
    deg_inv = (1.0 / jnp.maximum(deg, 1.0)).astype(jnp.float32)
    adj_cnt = adj.astype(jnp.bfloat16)                          # exact, half the HBM bytes

    H = params[-1][1].shape[-1]          # true output hidden width
    Hp = _round_up(H, 128)               # lane-dense padded final width

    # Row-stack per-relation + root weights so the kernel does ONE matmul per layer;
    # only the LAST layer is zero-padded to the lane-dense output width Hp.
    wb_args = []
    in_specs = [
        pl.BlockSpec((N, F0), lambda i: (0, 0)),                # x (resident)
        pl.BlockSpec((R, N, N), lambda i: (0, 0, 0)),           # 0/1 counts (bf16)
        pl.BlockSpec((R, N, 1), lambda i: (0, 0, 0)),           # 1/deg (f32)
    ]
    for l, (w_rel, w_root, bias) in enumerate(params):
        f_in, h_l = w_rel.shape[1], w_rel.shape[-1]
        w_big = jnp.concatenate([w_rel.reshape(R * f_in, h_l), w_root], axis=0)
        b = bias
        if l == L - 1:                                          # lane-dense final store
            w_big = jnp.zeros((w_big.shape[0], Hp), jnp.float32).at[:, :h_l].set(w_big)
            b = jnp.zeros((Hp,), jnp.float32).at[:h_l].set(bias)
        b = b.reshape(1, -1)
        wb_args += [w_big, b]
        in_specs += [pl.BlockSpec(w_big.shape, lambda i: (0, 0)),
                     pl.BlockSpec(b.shape, lambda i: (0, 0))]

    kernel = functools.partial(_fused_rgcn_kernel, L, R)
    out = pl.pallas_call(
        kernel,
        out_shape=jax.ShapeDtypeStruct((N, Hp), jnp.float32),
        grid=(1,),                       # everything resident; single fused step
        in_specs=in_specs,
        out_specs=pl.BlockSpec((N, Hp), lambda i: (0, 0)),
        compiler_params=pltpu.CompilerParams(
            dimension_semantics=("arbitrary",)),
    )(node_features, adj_cnt, deg_inv, *wb_args)

    # slice padded lanes back off; edge_features are not updated for arch='rgcn'
    return out[:, :H], edge_features


# ------------------------------------------------------------------
# pure-JAX reference (per-edge gather/scatter FastRGCNConv) for checking
# ------------------------------------------------------------------
def _ref_forward(node_features, edge_features, edge_flats, params, num_relations):
    if edge_flats.shape[0] != 2:
        edge_flats = edge_flats.T
    src, dst = edge_flats[0], edge_flats[1]
    labels = jnp.argmax(edge_features[:, : -1 * num_relations], axis=1)
    N = node_features.shape[0]
    x = node_features
    for (w_rel, w_root, bias) in params:
        H = w_rel.shape[-1]
        msgs = jnp.einsum("ef,efh->eh", x[src], w_rel[labels])
        one_hot = jax.nn.one_hot(labels, num_relations, dtype=jnp.float32)
        cnt = jnp.zeros((N, num_relations), jnp.float32).at[dst].add(one_hot)
        norm = 1.0 / jnp.maximum(cnt[dst, labels], 1.0)
        agg = jnp.zeros((N, H), jnp.float32).at[dst].add(norm[:, None] * msgs)
        x = jax.nn.relu(agg + x @ w_root + bias)
    return x, edge_features


# ------------------------------------------------------------------
# main
# ------------------------------------------------------------------
if __name__ == "__main__":
    # module config (arch='rgcn', act='relu', norm=None, dropout=0.0)
    node_feat_size = 32
    edge_feat_size = 8        # first (edge_feat_size - num_relations) cols -> argmax
    hidden_dim_size = 32
    num_heads = 4             # unused for rgcn
    num_layers = 2
    num_relations = 4

    N = 16                    # nodes
    E = 24                    # edges

    key = jax.random.PRNGKey(0)
    k_x, k_e, k_s, k_d, *k_w = jax.random.split(key, 5 + 3 * num_layers)

    node_features = jax.random.normal(k_x, (N, node_feat_size), jnp.float32)
    edge_features = jax.random.normal(k_e, (E, edge_feat_size), jnp.float32)
    src = jax.random.randint(k_s, (E,), 0, N, jnp.int32)
    dst = jax.random.randint(k_d, (E,), 0, N, jnp.int32)
    edge_flats = jnp.stack([src, dst], axis=1)          # (E, 2) -> transposed inside

    # deterministic parameter init (FastRGCNConv: weight (R,Fin,H), root (Fin,H), bias (H,))
    params = []
    fin = node_feat_size
    for layer in range(num_layers):
        kw, kr, kb = k_w[3 * layer], k_w[3 * layer + 1], k_w[3 * layer + 2]
        scale = 1.0 / jnp.sqrt(jnp.float32(fin))
        w_rel = jax.random.normal(kw, (num_relations, fin, hidden_dim_size), jnp.float32) * scale
        w_root = jax.random.normal(kr, (fin, hidden_dim_size), jnp.float32) * scale
        bias = jax.random.normal(kb, (hidden_dim_size,), jnp.float32) * 0.01
        params.append((w_rel, w_root, bias))
        fin = hidden_dim_size

    out_nodes, out_edges = gnn_forward(
        node_features, edge_features, edge_flats, params, num_relations
    )
    out_nodes = jax.block_until_ready(out_nodes)

    ref_nodes, ref_edges = _ref_forward(
        node_features, edge_features, edge_flats, params, num_relations
    )

    assert out_nodes.shape == (N, hidden_dim_size)
    assert jnp.allclose(out_nodes, ref_nodes, atol=1e-4, rtol=1e-4)
    assert jnp.array_equal(out_edges, edge_features)  # edge feats untouched for rgcn

    # TODO(synk): 'egat'/'rgat' arches, norm layers and dropout branches are not
    # exercised by this config and are not implemented here.
    print("KERNEL_OK")
</pallas_src>

<mosaic_0001>
module attributes {stable_mosaic.version = 11 : i64} {
  func.func @_fused_rgcn_kernel(%arg0: i32, %arg1: memref<16x32xf32, #tpu.memory_space<vmem>>, %arg2: memref<4x16x16xbf16, #tpu.memory_space<vmem>>, %arg3: memref<4x16x1xf32, #tpu.memory_space<vmem>>, %arg4: memref<160x32xf32, #tpu.memory_space<vmem>>, %arg5: memref<1x32xf32, #tpu.memory_space<vmem>>, %arg6: memref<160x128xf32, #tpu.memory_space<vmem>>, %arg7: memref<1x128xf32, #tpu.memory_space<vmem>>, %arg8: memref<16x128xf32, #tpu.memory_space<vmem>>) attributes {dimension_semantics = [#tpu.dimension_semantics<arbitrary>], iteration_bounds = array<i64: 1>, scalar_prefetch = 0 : i64, scratch_operands = 0 : i64, tpu.core_type = #tpu.core_type<tc>, window_params = [{pipeline_mode = #tpu.pipeline_mode<synchronous>, transform_indices = @transform_0, window_bounds = array<i64: 16, 32>}, {pipeline_mode = #tpu.pipeline_mode<synchronous>, transform_indices = @transform_1, window_bounds = array<i64: 4, 16, 16>}, {pipeline_mode = #tpu.pipeline_mode<synchronous>, transform_indices = @transform_2, window_bounds = array<i64: 4, 16, 1>}, {pipeline_mode = #tpu.pipeline_mode<synchronous>, transform_indices = @transform_3, window_bounds = array<i64: 160, 32>}, {pipeline_mode = #tpu.pipeline_mode<synchronous>, transform_indices = @transform_4, window_bounds = array<i64: 1, 32>}, {pipeline_mode = #tpu.pipeline_mode<synchronous>, transform_indices = @transform_5, window_bounds = array<i64: 160, 128>}, {pipeline_mode = #tpu.pipeline_mode<synchronous>, transform_indices = @transform_6, window_bounds = array<i64: 1, 128>}, {pipeline_mode = #tpu.pipeline_mode<synchronous>, transform_indices = @transform_7, window_bounds = array<i64: 16, 128>}]} {
    %c0 = arith.constant 0 : index
    %c0_0 = arith.constant 0 : index
    %0 = vector.load %arg1[%c0, %c0_0] : memref<16x32xf32, #tpu.memory_space<vmem>>, vector<16x32xf32>
    %c0_1 = arith.constant 0 : index
    %c0_2 = arith.constant 0 : index
    %c0_3 = arith.constant 0 : index
    %1 = vector.load %arg2[%c0_1, %c0_2, %c0_3] : memref<4x16x16xbf16, #tpu.memory_space<vmem>>, vector<1x16x16xbf16>
    %2 = vector.shape_cast %1 : vector<1x16x16xbf16> to vector<16x16xbf16>
    %3 = arith.extf %2 : vector<16x16xbf16> to vector<16x16xf32>
    %cst = arith.constant dense<0.000000e+00> : vector<16x32xf32>
    %4 = tpu.matmul %3, %0, %cst {dimension_numbers = #tpu.dot_dimension_numbers<[1], [0], [0], [1], [0, 0, 1, 1], [], []>} : vector<16x16xf32>, vector<16x32xf32>, vector<16x32xf32> -> vector<16x32xf32>
    %c0_4 = arith.constant 0 : index
    %c0_5 = arith.constant 0 : index
    %c0_6 = arith.constant 0 : index
    %5 = vector.load %arg3[%c0_4, %c0_5, %c0_6] : memref<4x16x1xf32, #tpu.memory_space<vmem>>, vector<1x16x1xf32>
    %6 = vector.shape_cast %5 : vector<1x16x1xf32> to vector<16x1xf32>
    %7 = vector.broadcast %6 : vector<16x1xf32> to vector<16x32xf32>
    %8 = arith.mulf %4, %7 : vector<16x32xf32>
    %c1 = arith.constant 1 : index
    %c0_7 = arith.constant 0 : index
    %c0_8 = arith.constant 0 : index
    %9 = vector.load %arg2[%c1, %c0_7, %c0_8] : memref<4x16x16xbf16, #tpu.memory_space<vmem>>, vector<1x16x16xbf16>
    %10 = vector.shape_cast %9 : vector<1x16x16xbf16> to vector<16x16xbf16>
    %11 = arith.extf %10 : vector<16x16xbf16> to vector<16x16xf32>
    %cst_9 = arith.constant dense<0.000000e+00> : vector<16x32xf32>
    %12 = tpu.matmul %11, %0, %cst_9 {dimension_numbers = #tpu.dot_dimension_numbers<[1], [0], [0], [1], [0, 0, 1, 1], [], []>} : vector<16x16xf32>, vector<16x32xf32>, vector<16x32xf32> -> vector<16x32xf32>
    %c1_10 = arith.constant 1 : index
    %c0_11 = arith.constant 0 : index
    %c0_12 = arith.constant 0 : index
    %13 = vector.load %arg3[%c1_10, %c0_11, %c0_12] : memref<4x16x1xf32, #tpu.memory_space<vmem>>, vector<1x16x1xf32>
    %14 = vector.shape_cast %13 : vector<1x16x1xf32> to vector<16x1xf32>
    %15 = vector.broadcast %14 : vector<16x1xf32> to vector<16x32xf32>
    %16 = arith.mulf %12, %15 : vector<16x32xf32>
    %c2 = arith.constant 2 : index
    %c0_13 = arith.constant 0 : index
    %c0_14 = arith.constant 0 : index
    %17 = vector.load %arg2[%c2, %c0_13, %c0_14] : memref<4x16x16xbf16, #tpu.memory_space<vmem>>, vector<1x16x16xbf16>
    %18 = vector.shape_cast %17 : vector<1x16x16xbf16> to vector<16x16xbf16>
    %19 = arith.extf %18 : vector<16x16xbf16> to vector<16x16xf32>
    %cst_15 = arith.constant dense<0.000000e+00> : vector<16x32xf32>
    %20 = tpu.matmul %19, %0, %cst_15 {dimension_numbers = #tpu.dot_dimension_numbers<[1], [0], [0], [1], [0, 0, 1, 1], [], []>} : vector<16x16xf32>, vector<16x32xf32>, vector<16x32xf32> -> vector<16x32xf32>
    %c2_16 = arith.constant 2 : index
    %c0_17 = arith.constant 0 : index
    %c0_18 = arith.constant 0 : index
    %21 = vector.load %arg3[%c2_16, %c0_17, %c0_18] : memref<4x16x1xf32, #tpu.memory_space<vmem>>, vector<1x16x1xf32>
    %22 = vector.shape_cast %21 : vector<1x16x1xf32> to vector<16x1xf32>
    %23 = vector.broadcast %22 : vector<16x1xf32> to vector<16x32xf32>
    %24 = arith.mulf %20, %23 : vector<16x32xf32>
    %c3 = arith.constant 3 : index
    %c0_19 = arith.constant 0 : index
    %c0_20 = arith.constant 0 : index
    %25 = vector.load %arg2[%c3, %c0_19, %c0_20] : memref<4x16x16xbf16, #tpu.memory_space<vmem>>, vector<1x16x16xbf16>
    %26 = vector.shape_cast %25 : vector<1x16x16xbf16> to vector<16x16xbf16>
    %27 = arith.extf %26 : vector<16x16xbf16> to vector<16x16xf32>
    %cst_21 = arith.constant dense<0.000000e+00> : vector<16x32xf32>
    %28 = tpu.matmul %27, %0, %cst_21 {dimension_numbers = #tpu.dot_dimension_numbers<[1], [0], [0], [1], [0, 0, 1, 1], [], []>} : vector<16x16xf32>, vector<16x32xf32>, vector<16x32xf32> -> vector<16x32xf32>
    %c3_22 = arith.constant 3 : index
    %c0_23 = arith.constant 0 : index
    %c0_24 = arith.constant 0 : index
    %29 = vector.load %arg3[%c3_22, %c0_23, %c0_24] : memref<4x16x1xf32, #tpu.memory_space<vmem>>, vector<1x16x1xf32>
    %30 = vector.shape_cast %29 : vector<1x16x1xf32> to vector<16x1xf32>
    %31 = vector.broadcast %30 : vector<16x1xf32> to vector<16x32xf32>
    %32 = arith.mulf %28, %31 : vector<16x32xf32>
    %33 = tpu.concatenate %8, %16, %24, %32, %0 in 1 : vector<16x32xf32>, vector<16x32xf32>, vector<16x32xf32>, vector<16x32xf32>, vector<16x32xf32> -> vector<16x160xf32>
    %c0_25 = arith.constant 0 : index
    %c0_26 = arith.constant 0 : index
    %34 = vector.load %arg4[%c0_25, %c0_26] : memref<160x32xf32, #tpu.memory_space<vmem>>, vector<160x32xf32>
    %cst_27 = arith.constant dense<0.000000e+00> : vector<16x32xf32>
    %35 = tpu.matmul %33, %34, %cst_27 {dimension_numbers = #tpu.dot_dimension_numbers<[1], [0], [0], [1], [0, 0, 1, 1], [], []>} : vector<16x160xf32>, vector<160x32xf32>, vector<16x32xf32> -> vector<16x32xf32>
    %c0_28 = arith.constant 0 : index
    %c0_29 = arith.constant 0 : index
    %36 = vector.load %arg5[%c0_28, %c0_29] : memref<1x32xf32, #tpu.memory_space<vmem>>, vector<1x32xf32>
    %37 = vector.broadcast %36 : vector<1x32xf32> to vector<16x32xf32>
    %38 = arith.addf %35, %37 : vector<16x32xf32>
    %cst_30 = arith.constant 0.000000e+00 : f32
    %39 = vector.broadcast %cst_30 : f32 to vector<16x32xf32>
    %40 = arith.maximumf %38, %39 : vector<16x32xf32>
    %c0_31 = arith.constant 0 : index
    %c0_32 = arith.constant 0 : index
    %c0_33 = arith.constant 0 : index
    %41 = vector.load %arg2[%c0_31, %c0_32, %c0_33] : memref<4x16x16xbf16, #tpu.memory_space<vmem>>, vector<1x16x16xbf16>
    %42 = vector.shape_cast %41 : vector<1x16x16xbf16> to vector<16x16xbf16>
    %43 = arith.extf %42 : vector<16x16xbf16> to vector<16x16xf32>
    %cst_34 = arith.constant dense<0.000000e+00> : vector<16x32xf32>
    %44 = tpu.matmul %43, %40, %cst_34 {dimension_numbers = #tpu.dot_dimension_numbers<[1], [0], [0], [1], [0, 0, 1, 1], [], []>} : vector<16x16xf32>, vector<16x32xf32>, vector<16x32xf32> -> vector<16x32xf32>
    %c0_35 = arith.constant 0 : index
    %c0_36 = arith.constant 0 : index
    %c0_37 = arith.constant 0 : index
    %45 = vector.load %arg3[%c0_35, %c0_36, %c0_37] : memref<4x16x1xf32, #tpu.memory_space<vmem>>, vector<1x16x1xf32>
    %46 = vector.shape_cast %45 : vector<1x16x1xf32> to vector<16x1xf32>
    %47 = vector.broadcast %46 : vector<16x1xf32> to vector<16x32xf32>
    %48 = arith.mulf %44, %47 : vector<16x32xf32>
    %c1_38 = arith.constant 1 : index
    %c0_39 = arith.constant 0 : index
    %c0_40 = arith.constant 0 : index
    %49 = vector.load %arg2[%c1_38, %c0_39, %c0_40] : memref<4x16x16xbf16, #tpu.memory_space<vmem>>, vector<1x16x16xbf16>
    %50 = vector.shape_cast %49 : vector<1x16x16xbf16> to vector<16x16xbf16>
    %51 = arith.extf %50 : vector<16x16xbf16> to vector<16x16xf32>
    %cst_41 = arith.constant dense<0.000000e+00> : vector<16x32xf32>
    %52 = tpu.matmul %51, %40, %cst_41 {dimension_numbers = #tpu.dot_dimension_numbers<[1], [0], [0], [1], [0, 0, 1, 1], [], []>} : vector<16x16xf32>, vector<16x32xf32>, vector<16x32xf32> -> vector<16x32xf32>
    %c1_42 = arith.constant 1 : index
    %c0_43 = arith.constant 0 : index
    %c0_44 = arith.constant 0 : index
    %53 = vector.load %arg3[%c1_42, %c0_43, %c0_44] : memref<4x16x1xf32, #tpu.memory_space<vmem>>, vector<1x16x1xf32>
    %54 = vector.shape_cast %53 : vector<1x16x1xf32> to vector<16x1xf32>
    %55 = vector.broadcast %54 : vector<16x1xf32> to vector<16x32xf32>
    %56 = arith.mulf %52, %55 : vector<16x32xf32>
    %c2_45 = arith.constant 2 : index
    %c0_46 = arith.constant 0 : index
    %c0_47 = arith.constant 0 : index
    %57 = vector.load %arg2[%c2_45, %c0_46, %c0_47] : memref<4x16x16xbf16, #tpu.memory_space<vmem>>, vector<1x16x16xbf16>
    %58 = vector.shape_cast %57 : vector<1x16x16xbf16> to vector<16x16xbf16>
    %59 = arith.extf %58 : vector<16x16xbf16> to vector<16x16xf32>
    %cst_48 = arith.constant dense<0.000000e+00> : vector<16x32xf32>
    %60 = tpu.matmul %59, %40, %cst_48 {dimension_numbers = #tpu.dot_dimension_numbers<[1], [0], [0], [1], [0, 0, 1, 1], [], []>} : vector<16x16xf32>, vector<16x32xf32>, vector<16x32xf32> -> vector<16x32xf32>
    %c2_49 = arith.constant 2 : index
    %c0_50 = arith.constant 0 : index
    %c0_51 = arith.constant 0 : index
    %61 = vector.load %arg3[%c2_49, %c0_50, %c0_51] : memref<4x16x1xf32, #tpu.memory_space<vmem>>, vector<1x16x1xf32>
    %62 = vector.shape_cast %61 : vector<1x16x1xf32> to vector<16x1xf32>
    %63 = vector.broadcast %62 : vector<16x1xf32> to vector<16x32xf32>
    %64 = arith.mulf %60, %63 : vector<16x32xf32>
    %c3_52 = arith.constant 3 : index
    %c0_53 = arith.constant 0 : index
    %c0_54 = arith.constant 0 : index
    %65 = vector.load %arg2[%c3_52, %c0_53, %c0_54] : memref<4x16x16xbf16, #tpu.memory_space<vmem>>, vector<1x16x16xbf16>
    %66 = vector.shape_cast %65 : vector<1x16x16xbf16> to vector<16x16xbf16>
    %67 = arith.extf %66 : vector<16x16xbf16> to vector<16x16xf32>
    %cst_55 = arith.constant dense<0.000000e+00> : vector<16x32xf32>
    %68 = tpu.matmul %67, %40, %cst_55 {dimension_numbers = #tpu.dot_dimension_numbers<[1], [0], [0], [1], [0, 0, 1, 1], [], []>} : vector<16x16xf32>, vector<16x32xf32>, vector<16x32xf32> -> vector<16x32xf32>
    %c3_56 = arith.constant 3 : index
    %c0_57 = arith.constant 0 : index
    %c0_58 = arith.constant 0 : index
    %69 = vector.load %arg3[%c3_56, %c0_57, %c0_58] : memref<4x16x1xf32, #tpu.memory_space<vmem>>, vector<1x16x1xf32>
    %70 = vector.shape_cast %69 : vector<1x16x1xf32> to vector<16x1xf32>
    %71 = vector.broadcast %70 : vector<16x1xf32> to vector<16x32xf32>
    %72 = arith.mulf %68, %71 : vector<16x32xf32>
    %73 = tpu.concatenate %48, %56, %64, %72, %40 in 1 : vector<16x32xf32>, vector<16x32xf32>, vector<16x32xf32>, vector<16x32xf32>, vector<16x32xf32> -> vector<16x160xf32>
    %c0_59 = arith.constant 0 : index
    %c0_60 = arith.constant 0 : index
    %74 = vector.load %arg6[%c0_59, %c0_60] : memref<160x128xf32, #tpu.memory_space<vmem>>, vector<160x128xf32>
    %cst_61 = arith.constant dense<0.000000e+00> : vector<16x128xf32>
    %75 = tpu.matmul %73, %74, %cst_61 {dimension_numbers = #tpu.dot_dimension_numbers<[1], [0], [0], [1], [0, 0, 1, 1], [], []>} : vector<16x160xf32>, vector<160x128xf32>, vector<16x128xf32> -> vector<16x128xf32>
    %c0_62 = arith.constant 0 : index
    %c0_63 = arith.constant 0 : index
    %76 = vector.load %arg7[%c0_62, %c0_63] : memref<1x128xf32, #tpu.memory_space<vmem>>, vector<1x128xf32>
    %77 = vector.broadcast %76 : vector<1x128xf32> to vector<16x128xf32>
    %78 = arith.addf %75, %77 : vector<16x128xf32>
    %cst_64 = arith.constant 0.000000e+00 : f32
    %79 = vector.broadcast %cst_64 : f32 to vector<16x128xf32>
    %80 = arith.maximumf %78, %79 : vector<16x128xf32>
    %c0_65 = arith.constant 0 : index
    %c0_66 = arith.constant 0 : index
    %81 = vector.load %arg8[%c0_65, %c0_66] : memref<16x128xf32, #tpu.memory_space<vmem>>, vector<16x128xf32>
    tpu.vector_store %arg8[%c0_65, %c0_66], %80 {strides = array<i32>} : memref<16x128xf32, #tpu.memory_space<vmem>>, vector<16x128xf32>,
    return
  }
  func.func @transform_0(%arg0: i32) -> (i32, i32) {
    %c0_i32 = arith.constant 0 : i32
    %c0_i32_0 = arith.constant 0 : i32
    %c0_i32_1 = arith.constant 0 : i32
    return %c0_i32, %c0_i32_0 : i32, i32
  }
  func.func @transform_1(%arg0: i32) -> (i32, i32, i32) {
    %c0_i32 = arith.constant 0 : i32
    %c0_i32_0 = arith.constant 0 : i32
    %c0_i32_1 = arith.constant 0 : i32
    %c0_i32_2 = arith.constant 0 : i32
    return %c0_i32, %c0_i32_0, %c0_i32_1 : i32, i32, i32
  }
  func.func @transform_2(%arg0: i32) -> (i32, i32, i32) {
    %c0_i32 = arith.constant 0 : i32
    %c0_i32_0 = arith.constant 0 : i32
    %c0_i32_1 = arith.constant 0 : i32
    %c0_i32_2 = arith.constant 0 : i32
    return %c0_i32, %c0_i32_0, %c0_i32_1 : i32, i32, i32
  }
  func.func @transform_3(%arg0: i32) -> (i32, i32) {
    %c0_i32 = arith.constant 0 : i32
    %c0_i32_0 = arith.constant 0 : i32
    %c0_i32_1 = arith.constant 0 : i32
    return %c0_i32, %c0_i32_0 : i32, i32
  }
  func.func @transform_4(%arg0: i32) -> (i32, i32) {
    %c0_i32 = arith.constant 0 : i32
    %c0_i32_0 = arith.constant 0 : i32
    %c0_i32_1 = arith.constant 0 : i32
    return %c0_i32, %c0_i32_0 : i32, i32
  }
  func.func @transform_5(%arg0: i32) -> (i32, i32) {
    %c0_i32 = arith.constant 0 : i32
    %c0_i32_0 = arith.constant 0 : i32
    %c0_i32_1 = arith.constant 0 : i32
    return %c0_i32, %c0_i32_0 : i32, i32
  }
  func.func @transform_6(%arg0: i32) -> (i32, i32) {
    %c0_i32 = arith.constant 0 : i32
    %c0_i32_0 = arith.constant 0 : i32
    %c0_i32_1 = arith.constant 0 : i32
    return %c0_i32, %c0_i32_0 : i32, i32
  }
  func.func @transform_7(%arg0: i32) -> (i32, i32) {
    %c0_i32 = arith.constant 0 : i32
    %c0_i32_0 = arith.constant 0 : i32
    %c0_i32_1 = arith.constant 0 : i32
    return %c0_i32, %c0_i32_0 : i32, i32
  }
}

</mosaic_0001>

<bundles_post_ra>
// kernel: tpu_custom_call.1
= control target key start
LH: loop header
LB: loop body
LE: loop exit
PB: predicated region body
PF: predicated region fallthrough
CT: control target
= control target key end

     0   :  { %vm33_vm0 = vcmask 130048   ;;  %v1308_v6 = vmov 0   ;;  %s1687_s0 = inlined_call_operand.vmem [shape: f32[16,32], index: 0, kind: input, shape index: {}]   ;;  %s1688_s1 = inlined_call_operand.vmem [shape: bf16[4,16,16], index: 1, kind: input, shape index: {}]   ;;  %s1689_s2 = inlined_call_operand.vmem [shape: f32[4,16,1], index: 2, kind: input, shape index: {}]   ;;  %s1690_s3 = inlined_call_operand.vmem [shape: f32[160,32], index: 3, kind: input, shape index: {}]   ;;  %s1691_s4 = inlined_call_operand.vmem [shape: f32[1,32], index: 4, kind: input, shape index: {}]   ;;  %s1692_s5 = inlined_call_operand.vmem [shape: f32[160,128], index: 5, kind: input, shape index: {}]   ;;  %s1693_s6 = inlined_call_operand.vmem [shape: f32[1,128], index: 6, kind: input, shape index: {}]   ;;  %s1694_s7 = inlined_call_operand.hbm [shape: f32[16,128], index: 7, kind: output, shape index: {}]  }
   0x1   :  { %v27_v0 = vld [vmem:[%s1687_s0] sm:$0xff]  ;;  %v1362_v1 = vld [vmem:[%s1687_s0 + $0x8] sm:$0xff]  ;;  %1283 = vset.pattern.permute.xlu1 %v1308_v6  ;;  %1282 = vset.pattern.permute.xlu0 %v1308_v6  ;;  %v1059_v7 = vld [vmem:[%s1689_s2 + $0x30] sm:$0xff] }
   0x2   :  { %v1367_v2 = vld [vmem:[%s1688_s1] sm:$0xff]   ;;  %v1182_v3 = vpack.c.bf16 %v1362_v1, %v27_v0  ;;  %v1374_v5 = vld [vmem:[%s1688_s1 + $0x8] sm:$0xff]   ;;  %v1047_v8 = vld [vmem:[%s1689_s2 + $0x10] sm:$0xff]  ;;  %422 = vperm.xlu1 %1283, %v1059_v7  }
   0x3   :  { %v1077_v4 = vunpack.c.l.bf16 %v1367_v2  ;;  %v1078_v9 = vunpack.c.h.bf16 %v1367_v2  ;;  %v1081_v10 = vunpack.c.l.bf16 %v1374_v5 }
   0x4   :  { %1183 = vmatprep.subr.bf16.mxu0 %v1182_v3 }
   0x5   :  { %1130 = vmatprep.mubr.msk.f32.mxu0 %vm33_vm0, %v1077_v4  ;;  %1185 = vmatpush3.bf16.msra.mxu0 %v1182_v3 }
   0x6   :  { %12 = vsyncpa [#allocation3], 0  ;;  %1187 = vmatprep.subr.bf16.mxu0 %v1182_v3  ;;  %v1388_v11 = vld [vmem:[%s1688_s1 + $0x10] sm:$0xff]   ;;  %220 = vperm.xlu0 %1282, %v1047_v8   ;;  %v1048_v12 = vld [vmem:[%s1689_s2 + $0x18] sm:$0xff]  ;;  %v1082_v13 = vunpack.c.h.bf16 %v1374_v5  ;;  %vm456_vm1 = vcmask 261120   ;;  %v1309_v27 = vmov 0.0|0.0  }
   0x7   :  { %1158 = vmatprep.mubr.msk.f32.mxu1 %vm33_vm0, %v1077_v4  ;;  %v1053_v14 = vld [vmem:[%s1689_s2 + $0x20] sm:$0xff]  ;;  %v1085_v15 = vunpack.c.l.bf16 %v1388_v11  ;;  %v1408_v16 = vld [vmem:[%s1688_s1 + $0x18] sm:$0xff]   ;;  %225 = vperm.xlu1 %1283, %v1048_v12   ;;  %v1086_v18 = vunpack.c.h.bf16 %v1388_v11  ;;  %v1054_v19 = vld [vmem:[%s1689_s2 + $0x28] sm:$0xff]  ;;  %s1310_s16 = smov 32   ;;  %s1312_s17 = smov 96   ;;  %vm459_vm2 = vcmask 523264  }
   0x8   :  { %1131 = vmatmul.mubr.msk.f32.vlgmr.msra.gmra.mrb[0].mxu0 %vm33_vm0, %v1078_v9  ;;  %v1060_v17 = vld [vmem:[%s1689_s2 + $0x38] sm:$0xff]  ;;  %v1089_v20 = vunpack.c.l.bf16 %v1408_v16  ;;  %v116_v21 = vld [vmem:[%s1689_s2 + $0x8] sm:$0xff]  ;;  %v1090_v22 = vunpack.c.h.bf16 %v1408_v16  ;;  %v115_v23 = vld [vmem:[%s1689_s2] sm:$0xff]  ;;  %vm462_vm3 = vcmask 785408  }
   0x9   :  { %1189 = vmatpush3.bf16.msra.mxu0 %v1182_v3  ;;  %1137 = vmatprep.mubr.msk.f32.mxu0 %vm33_vm0, %v1081_v10  ;;  %v465_v24 = vld [vmem:[%s1690_s3] sm:$0xff]  ;;  %v466_v25 = vld [vmem:[%s1690_s3 + $0x8] sm:$0xff]  ;;  %v467_v26 = vld [vmem:[%s1690_s3 + $0x10] sm:$0xff] }
   0xa   :  { %1191 = vmatprep.subr.bf16.mxu0 %v1182_v3  ;;  %321 = vperm.xlu0 %1282, %v1053_v14   ;;  %v1199_v28 = vpack.c.bf16 %v466_v25, %v465_v24  ;;  %v468_v29 = vld [vmem:[%s1690_s3 + $0x18] sm:$0xff]  ;;  %v469_v31 = vld [vmem:[%s1690_s3 + $0x20] sm:$0xff]  ;;  %v470_v32 = vld [vmem:[%s1690_s3 + $0x28] sm:$0xff] }
   0xb   :  { %427 = vperm.xlu1 %1283, %v1060_v17   ;;  %v1202_v30 = vpack.c.bf16 %v468_v29, %v467_v26  ;;  %v1205_v33 = vpack.c.bf16 %v470_v32, %v469_v31  ;;  %v471_v34 = vld [vmem:[%s1690_s3 + $0x30] sm:$0xff]  ;;  %v472_v35 = vld [vmem:[%s1690_s3 + $0x38] sm:$0xff]  ;;  %v473_v37 = vld [vmem:[%s1690_s3 + $0x40] sm:$0xff] }
   0xc   :  { %1138 = vmatmul.mubr.msk.f32.vlgmr.msra.gmra.mrb[2].mxu0 %vm33_vm0, %v1082_v13  ;;  %v1208_v36 = vpack.c.bf16 %v472_v35, %v471_v34  ;;  %v474_v38 = vld [vmem:[%s1690_s3 + $0x48] sm:$0xff]  ;;  %v475_v40 = vld [vmem:[%s1690_s3 + $0x50] sm:$0xff]  ;;  %v476_v41 = vld [vmem:[%s1690_s3 + $0x58] sm:$0xff] }
   0xd   :  { %1193 = vmatpush3.bf16.msra.mxu0 %v1182_v3  ;;  %1144 = vmatprep.mubr.msk.f32.mxu0 %vm33_vm0, %v1085_v15  ;;  %v1211_v39 = vpack.c.bf16 %v474_v38, %v473_v37  ;;  %v1214_v42 = vpack.c.bf16 %v476_v41, %v475_v40  ;;  %v477_v43 = vld [vmem:[%s1690_s3 + $0x60] sm:$0xff]  ;;  %v478_v44 = vld [vmem:[%s1690_s3 + $0x68] sm:$0xff]  ;;  %v479_v46 = vld [vmem:[%s1690_s3 + $0x70] sm:$0xff] }
   0xe   :  { %1195 = vmatprep.subr.bf16.mxu0 %v1182_v3  ;;  %326 = vperm.xlu0 %1282, %v1054_v19   ;;  %v1217_v45 = vpack.c.bf16 %v478_v44, %v477_v43  ;;  %v480_v47 = vld [vmem:[%s1690_s3 + $0x78] sm:$0xff]  ;;  %v481_v49 = vld [vmem:[%s1690_s3 + $0x80] sm:$0xff]  ;;  %v482_v50 = vld [vmem:[%s1690_s3 + $0x88] sm:$0xff] }
   0xf   :  { %124 = vperm.xlu1 %1283, %v116_v21   ;;  %v1220_v48 = vpack.c.bf16 %v480_v47, %v479_v46  ;;  %v1223_v51 = vpack.c.bf16 %v482_v50, %v481_v49  ;;  %v483_v52 = vld [vmem:[%s1690_s3 + $0x90] sm:$0xff]  ;;  %v484_v53 = vld [vmem:[%s1690_s3 + $0x98] sm:$0xff]  ;;  %s1311_s3 = smov 64   ;;  %v1061_v41 = vld [vmem:[%s1691_s4] ss:$0 sm:$0xff] }
  0x10   :  { %1145 = vmatmul.mubr.msk.f32.vlgmr.msra.gmra.mrb[4].mxu0 %vm33_vm0, %v1086_v18  ;;  %v1226_v54 = vpack.c.bf16 %v484_v53, %v483_v52  ;;  %v913_v2 = vld [vmem:[%s1692_s5] sm:$0xff]  ;;  %v914_v5 = vld [vmem:[%s1692_s5 + $0x8] sm:$0xff]  ;;  %v916_v11 = vld [vmem:[%s1692_s5 + $0x18] sm:$0xff] }
  0x11   :  { %1197 = vmatpush3.bf16.msra.mxu0 %v1182_v3  ;;  %1151 = vmatprep.mubr.msk.f32.mxu0 %vm33_vm0, %v1089_v20  ;;  %v918_v16 = vld [vmem:[%s1692_s5 + $0x28] sm:$0xff]  ;;  %v921_v50 = vld [vmem:[%s1692_s5 + $0x40] sm:$0xff]  ;;  %v923_v53 = vld [vmem:[%s1692_s5 + $0x50] sm:$0xff] }
  0x12   :  { %119 = vperm.xlu0 %1282, %v115_v23   ;;  %1198 = vmatprep.subr.bf16.mxu0 %v1309_v27 }
  0x14   :  { %1152 = vmatmul.mubr.msk.f32.vlgmr.msra.gmra.mrb[6].mxu0 %vm33_vm0, %v1090_v22 }
  0x15   :  { %1062 = vmatprep.mubr.msk.f32.mxu0 %vm456_vm1, %v27_v0  ;;  %1200 = vmatpush1.bf16.msra.mxu0 %v1199_v28 }
  0x16   :  { %1201 = vmatprep.subr.bf16.mxu0 %v1309_v27 }
  0x19   :  { %1203 = vmatpush1.bf16.msra.mxu0 %v1202_v30 }
  0x1a   :  { %1204 = vmatprep.subr.bf16.mxu0 %v1309_v27 }
  0x1d   :  { %1206 = vmatpush1.bf16.msra.mxu0 %v1205_v33 }
  0x1e   :  { %1207 = vmatprep.subr.bf16.mxu0 %v1309_v27 }
  0x21   :  { %1209 = vmatpush1.bf16.msra.mxu0 %v1208_v36 }
  0x22   :  { %1210 = vmatprep.subr.bf16.mxu0 %v1309_v27 }
  0x25   :  { %1212 = vmatpush1.bf16.msra.mxu0 %v1211_v39 }
  0x26   :  { %1213 = vmatprep.subr.bf16.mxu0 %v1309_v27 }
  0x29   :  { %1215 = vmatpush1.bf16.msra.mxu0 %v1214_v42 }
  0x2a   :  { %1216 = vmatprep.subr.bf16.mxu0 %v1309_v27 }
  0x2d   :  { %1218 = vmatpush1.bf16.msra.mxu0 %v1217_v45 }
  0x2e   :  { %1219 = vmatprep.subr.bf16.mxu0 %v1309_v27 }
  0x31   :  { %1221 = vmatpush1.bf16.msra.mxu0 %v1220_v48 }
  0x32   :  { %1222 = vmatprep.subr.bf16.mxu0 %v1309_v27 }
  0x35   :  { %1224 = vmatpush1.bf16.msra.mxu0 %v1223_v51  ;;  %v922_v51 = vld [vmem:[%s1692_s5 + $0x48] sm:$0xff] }
  0x36   :  { %1225 = vmatprep.subr.bf16.mxu0 %v1309_v27  ;;  %v1257_v52 = vpack.c.bf16 %v922_v51, %v921_v50 }
  0x39   :  { %1227 = vmatpush1.bf16.msra.mxu0 %v1226_v54  ;;  %v924_v54 = vld [vmem:[%s1692_s5 + $0x58] sm:$0xff] }
  0x81   :  { %v1513_v59 = vpop.permute.xlu1 %422 }
  0x85   :  { %v1511_v57 = vpop.permute.xlu0 %220 }
  0x86   :  { %v1520_v4 = vpop.permute.xlu1 %225 }
  0x89   :  { %v1517_v63 = vpop.permute.xlu0 %321 }
  0x8a   :  { %v1527_v14 = vpop.permute.xlu1 %427 }
  0x8d   :  { %v1529_v17 = vpop.permute.xlu0 %326 }
  0x8e   :  { %v1535_v23 = vpop.permute.xlu1 %124 }
  0x91   :  { %v1537_v24 = vpop.permute.xlu0 %119 }
  0xdb   :  { %v1132_v55 = vpop.f32.mrb[0].mxu0 }
  0xdc   :  { %v106_v56 = vpop.f32.mrb[1].mxu0  ;;  %v128_v34 = vmul.f32 %v1132_v55, %v1535_v23  ;;  %v1260_v55 = vpack.c.bf16 %v924_v54, %v923_v53 }
  0xdd   :  { %v127_v28 = vmul.f32 %v1537_v24, %v106_v56  ;;  %v925_v56 = vld [vmem:[%s1692_s5 + $0x60] sm:$0xff] }
  0xdf   :  { %v1139_v58 = vpop.f32.mrb[2].mxu0 }
  0xe0   :  { %v206_v60 = vpop.f32.mrb[3].mxu0  ;;  %v229_v8 = vmul.f32 %v1139_v58, %v1520_v4  ;;  %v926_v58 = vld [vmem:[%s1692_s5 + $0x68] sm:$0xff] }
  0xe1   :  { %v228_v61 = vmul.f32 %v1511_v57, %v206_v60  ;;  %v1263_v60 = vpack.c.bf16 %v926_v58, %v925_v56 }
  0xe3   :  { %v1146_v62 = vpop.f32.mrb[4].mxu0  ;;  %434 = vrot.lane.b32.xlu0 %v228_v61, %s1310_s16  ;;  %v927_v61 = vld [vmem:[%s1692_s5 + $0x70] sm:$0xff] }
  0xe4   :  { %v307_v0 = vpop.f32.mrb[5].mxu0  ;;  %v330_v19 = vmul.f32 %v1146_v62, %v1529_v17  ;;  %v928_v62 = vld [vmem:[%s1692_s5 + $0x78] sm:$0xff] }
  0xe5   :  { %v329_v3 = vmul.f32 %v1517_v63, %v307_v0  ;;  %v1266_v0 = vpack.c.bf16 %v928_v62, %v927_v61 }
  0xe7   :  { %v1153_v6 = vpop.f32.mrb[6].mxu0  ;;  %442 = vrot.lane.b32.xlu1 %v329_v3, %s1311_s3  ;;  %v929_v3 = vld [vmem:[%s1692_s5 + $0x80] sm:$0xff] }
  0xe8   :  { %v408_v7 = vpop.f32.mrb[7].mxu0  ;;  %v431_v21 = vmul.f32 %v1153_v6, %v1527_v14  ;;  %v930_v6 = vld [vmem:[%s1692_s5 + $0x88] sm:$0xff] }
  0xe9   :  { %v430_v12 = vmul.f32 %v1513_v59, %v408_v7  ;;  %v1269_v7 = vpack.c.bf16 %v930_v6, %v929_v3 }
  0xeb   :  { %436 = vrot.lane.b32.xlu1 %v229_v8, %s1310_s16  ;;  %450 = vrot.lane.b32.xlu0 %v430_v12, %s1312_s17  ;;  %v931_v8 = vld [vmem:[%s1692_s5 + $0x90] sm:$0xff]  ;;  %v932_v12 = vld [vmem:[%s1692_s5 + $0x98] sm:$0xff] }
  0xef   :  { %452 = vrot.lane.b32.xlu1 %v431_v21, %s1312_s17  ;;  %444 = vrot.lane.b32.xlu0 %v330_v19, %s1311_s3  ;;  %v1272_v19 = vpack.c.bf16 %v932_v12, %v931_v8 }
 0x155   :  { %v435_v25 = vpop.permute.xlu0 %434 }
 0x156   :  { %v457_v29 = vsel %vm456_vm1, %v127_v28, %v435_v25 }
 0x159   :  { %v443_v26 = vpop.permute.xlu1 %442 }
 0x15a   :  { %v460_v30 = vsel %vm459_vm2, %v457_v29, %v443_v26 }
 0x15d   :  { %v437_v31 = vpop.permute.xlu1 %436  ;;  %v451_v32 = vpop.permute.xlu0 %450 }
 0x15e   :  { %v463_v33 = vsel %vm462_vm3, %v460_v30, %v451_v32  ;;  %v458_v35 = vsel %vm456_vm1, %v128_v34, %v437_v31 }
 0x15f   :  { %563 = vmatmul.mubr.f32.vlgmr.msra.gmra.mrb[8].mxu0 %v463_v33 }
 0x160   :  { %1063 = vmatprep.mubr.msk.f32.mxu0 %vm456_vm1, %v1362_v1 }
 0x161   :  { %v453_v36 = vpop.permute.xlu1 %452  ;;  %v445_v37 = vpop.permute.xlu0 %444 }
 0x162   :  { %v461_v38 = vsel %vm459_vm2, %v458_v35, %v445_v37 }
 0x163   :  { %v464_v39 = vsel %vm462_vm3, %v461_v38, %v453_v36 }
 0x164   :  { %568 = vmatmul.mubr.f32.gmra.mrb[10].mxu0 %v464_v39 }
 0x232   :  { %v564_v40 = vpop.f32.mrb[8].mxu0 }
 0x233   :  { %v566_v42 = vpop.f32.mrb[9].mxu0  ;;  %v565_v43 = vadd.f32 %v1061_v41, %v564_v40 }
 0x235   :  { %v573_v46 = vmax.f32 %v565_v43, 0.0 }
 0x237   :  { %v569_v44 = vpop.f32.mrb[10].mxu0 }
 0x238   :  { %v1552_v45 = vadd.f32 %v1061_v41, %v569_v44  ;;  %v571_v1 = vpop.f32.mrb[11].mxu0 }
 0x239   :  { %v1072_v1 = vld [vmem:[%s1693_s6] ss:$0 sm:$0xff] }
 0x23a   :  { %v574_v47 = vmax.f32 %v1552_v45, 0.0 }
 0x23c   :  { %v1228_v48 = vpack.c.bf16 %v574_v47, %v573_v46 }
 0x23e   :  { %1229 = vmatprep.subr.bf16.mxu1 %v1228_v48 }
 0x23f   :  { %1231 = vmatpush3.bf16.msra.mxu1 %v1228_v48 }
 0x240   :  { %1233 = vmatprep.subr.bf16.mxu1 %v1228_v48 }
 0x242   :  { %1159 = vmatmul.mubr.msk.f32.vlgmr.msra.gmra.mrb[0].mxu1 %vm33_vm0, %v1078_v9  ;;  %v915_v9 = vld [vmem:[%s1692_s5 + $0x10] sm:$0xff] }
 0x243   :  { %1235 = vmatpush3.bf16.msra.mxu1 %v1228_v48  ;;  %1165 = vmatprep.mubr.msk.f32.mxu1 %vm33_vm0, %v1081_v10  ;;  %v1245_v10 = vpack.c.bf16 %v914_v5, %v913_v2 }
 0x244   :  { %1237 = vmatprep.subr.bf16.mxu1 %v1228_v48 }
 0x246   :  { %1166 = vmatmul.mubr.msk.f32.vlgmr.msra.gmra.mrb[2].mxu1 %vm33_vm0, %v1082_v13  ;;  %v1248_v13 = vpack.c.bf16 %v916_v11, %v915_v9 }
 0x247   :  { %1239 = vmatpush3.bf16.msra.mxu1 %v1228_v48  ;;  %1172 = vmatprep.mubr.msk.f32.mxu1 %vm33_vm0, %v1085_v15  ;;  %v917_v15 = vld [vmem:[%s1692_s5 + $0x20] sm:$0xff] }
 0x248   :  { %1241 = vmatprep.subr.bf16.mxu1 %v1228_v48 }
 0x24a   :  { %1173 = vmatmul.mubr.msk.f32.vlgmr.msra.gmra.mrb[4].mxu1 %vm33_vm0, %v1086_v18  ;;  %v1251_v18 = vpack.c.bf16 %v918_v16, %v917_v15 }
 0x24b   :  { %1243 = vmatpush3.bf16.msra.mxu1 %v1228_v48  ;;  %1179 = vmatprep.mubr.msk.f32.mxu1 %vm33_vm0, %v1089_v20  ;;  %v919_v20 = vld [vmem:[%s1692_s5 + $0x30] sm:$0xff] }
 0x24c   :  { %1244 = vmatprep.subr.bf16.mxu1 %v1309_v27 }
 0x24e   :  { %1180 = vmatmul.mubr.msk.f32.vlgmr.msra.gmra.mrb[6].mxu1 %vm33_vm0, %v1090_v22  ;;  %v920_v22 = vld [vmem:[%s1692_s5 + $0x38] sm:$0xff] }
 0x24f   :  { %1073 = vmatprep.mubr.msk.f32.mxu1 %vm456_vm1, %v573_v46  ;;  %1246 = vmatpush1.bf16.msra.mxu1 %v1245_v10  ;;  %v1254_v49 = vpack.c.bf16 %v920_v22, %v919_v20 }
 0x250   :  { %1247 = vmatprep.subr.bf16.mxu1 %v1309_v27 }
 0x253   :  { %1249 = vmatpush1.bf16.msra.mxu1 %v1248_v13 }
 0x254   :  { %1250 = vmatprep.subr.bf16.mxu1 %v1309_v27 }
 0x257   :  { %1252 = vmatpush1.bf16.msra.mxu1 %v1251_v18 }
 0x258   :  { %1253 = vmatprep.subr.bf16.mxu1 %v1309_v27 }
 0x25b   :  { %1255 = vmatpush1.bf16.msra.mxu1 %v1254_v49 }
 0x25c   :  { %1256 = vmatprep.subr.bf16.mxu1 %v1309_v27 }
 0x25f   :  { %1258 = vmatpush1.bf16.msra.mxu1 %v1257_v52 }
 0x260   :  { %1259 = vmatprep.subr.bf16.mxu1 %v1309_v27 }
 0x263   :  { %1261 = vmatpush1.bf16.msra.mxu1 %v1260_v55 }
 0x264   :  { %1262 = vmatprep.subr.bf16.mxu1 %v1309_v27 }
 0x267   :  { %1264 = vmatpush1.bf16.msra.mxu1 %v1263_v60 }
 0x268   :  { %1265 = vmatprep.subr.bf16.mxu1 %v1309_v27 }
 0x26b   :  { %1267 = vmatpush1.bf16.msra.mxu1 %v1266_v0 }
 0x26c   :  { %1268 = vmatprep.subr.bf16.mxu1 %v1309_v27 }
 0x26f   :  { %1270 = vmatpush1.bf16.msra.mxu1 %v1269_v7 }
 0x270   :  { %1271 = vmatprep.subr.bf16.mxu1 %v1309_v27 }
 0x273   :  { %1273 = vmatpush1.bf16.msra.mxu1 %v1272_v19 }
 0x315   :  { %v1160_v21 = vpop.f32.mrb[0].mxu1 }
 0x316   :  { %v641_v25 = vpop.f32.mrb[1].mxu1 }
 0x317   :  { %v650_v38 = vmul.f32 %v641_v25, %v1537_v24 }
 0x319   :  { %v1167_v26 = vpop.f32.mrb[2].mxu1 }
 0x31a   :  { %v718_v28 = vpop.f32.mrb[3].mxu1  ;;  %v728_v34 = vmul.f32 %v1167_v26, %v1520_v4 }
 0x31b   :  { %v727_v29 = vmul.f32 %v718_v28, %v1511_v57 }
 0x31d   :  { %v1174_v30 = vpop.f32.mrb[4].mxu1  ;;  %885 = vrot.lane.b32.xlu0 %v727_v29, %s1310_s16 }
 0x31e   :  { %v795_v27 = vpop.f32.mrb[5].mxu1  ;;  %v805_v57 = vmul.f32 %v1174_v30, %v1529_v17  ;;  %v651_v17 = vmul.f32 %v1160_v21, %v1535_v23 }
 0x31f   :  { %v804_v31 = vmul.f32 %v795_v27, %v1517_v63 }
 0x321   :  { %v1181_v32 = vpop.f32.mrb[6].mxu1  ;;  %893 = vrot.lane.b32.xlu1 %v804_v31, %s1311_s3 }
 0x322   :  { %v872_v33 = vpop.f32.mrb[7].mxu1  ;;  %v882_v36 = vmul.f32 %v1181_v32, %v1527_v14 }
 0x323   :  { %v881_v35 = vmul.f32 %v872_v33, %v1513_v59 }
 0x325   :  { %887 = vrot.lane.b32.xlu1 %v728_v34, %s1310_s16  ;;  %901 = vrot.lane.b32.xlu0 %v881_v35, %s1312_s17 }
 0x329   :  { %903 = vrot.lane.b32.xlu1 %v882_v36, %s1312_s17  ;;  %895 = vrot.lane.b32.xlu0 %v805_v57, %s1311_s3  ;;  %s1313_s3 = smov [#allocation2]  }
 0x32a   :  { %s1030_s17 = sshll.u32 %s1313_s3, 4  ;;  %s1031_s17 = int_to_ptr.vmem [resolvable:$true] %s1030_s17 }
 0x32b   :  { %s1284_s0 = scalar_lea.vmem %s1031_s17, 256  ;;  %p1289_p1 = scmp.lt.s32.totalorder %s1031_s17, %s1031_s17 }
 0x32c   :  { %p1285_p0 = scmp.ne.s32.totalorder %s1031_s17, %s1284_s0  ;;  %p1290_p2 = scmp.lt.s32.totalorder %s1284_s0, %s1284_s0 }
 0x32e   :  { %p1291_p3 = por %p1290_p2, %p1289_p1 }
 0x330   :  { %p1292_p4 = pnand %p1291_p3, %p1285_p0 }
 0x38f   :  { %v886_v63 = vpop.permute.xlu0 %885 }
 0x390   :  { %v907_v4 = vsel %vm456_vm1, %v650_v38, %v886_v63 }
 0x393   :  { %v894_v37 = vpop.permute.xlu1 %893 }
 0x394   :  { %v909_v59 = vsel %vm459_vm2, %v907_v4, %v894_v37 }
 0x397   :  { %v888_v39 = vpop.permute.xlu1 %887  ;;  %v902_v40 = vpop.permute.xlu0 %901 }
 0x398   :  { %v911_v41 = vsel %vm462_vm3, %v909_v59, %v902_v40  ;;  %v908_v14 = vsel %vm456_vm1, %v651_v17, %v888_v39 }
 0x399   :  { %1011 = vmatmul.mubr.f32.vlgmr.msra.gmra.mrb[8].mxu1 %v911_v41 }
 0x39a   :  { %1074 = vmatprep.mubr.msk.f32.mxu1 %vm456_vm1, %v574_v47 }
 0x39b   :  { %v904_v42 = vpop.permute.xlu1 %903  ;;  %v896_v43 = vpop.permute.xlu0 %895 }
 0x39c   :  { %v910_v24 = vsel %vm459_vm2, %v908_v14, %v896_v43 }
 0x39d   :  { %v912_v44 = vsel %vm462_vm3, %v910_v24, %v904_v42 }
 0x39e   :  { %1016 = vmatmul.mubr.f32.gmra.mrb[10].mxu1 %v912_v44 }
 0x46c   :  { %v1012_v46 = vpop.f32.mrb[8].mxu1 }
 0x46d   :  { %v1013_v23 = vadd.f32 %v1072_v1, %v1012_v46  ;;  %v1014_v48 = vpop.f32.mrb[9].mxu1 }
 0x46f   :  { %v1021_v2 = vmax.f32 %v1013_v23, 0.0 }
 0x471   :  { %1023 = vst [vmem:[#allocation2] sm:$0xff] %v1021_v2  ;;  %v1017_v45 = vpop.f32.mrb[10].mxu1 }
 0x472   :  { %v1018_v47 = vadd.f32 %v1072_v1, %v1017_v45  ;;  %v1019_v5 = vpop.f32.mrb[11].mxu1 }
 0x474   :  { %v1022_v9 = vmax.f32 %v1018_v47, 0.0 }
 0x476   :  { %1024 = vst [vmem:[#allocation2 + $0x8] sm:$0xff] %v1022_v9 }
 0x477   :  { %1295 = shalt.err (!%p1292_p4)
}
 0x478   :  { %s1296_s10 = scalar_lea.hbm %s1694_s7, 256 }
 0x479   :  { %p1297_p5 = scmp.ne.s32.totalorder %s1694_s7, %s1296_s10  ;;  %p1300_p6 = scmp.lt.u32.totalorder %s1296_s10, %s1694_s7 }
 0x47b   :  { %p1302_p7 = pnand %p1300_p6, %p1297_p5 }
 0x47d   :  { %1305 = shalt.err (!%p1302_p7)
}
 0x47e   :  { %s1314_s15 = smov 128   ;;  %s1315_s18 = smov 8  }
 0x47f   :  { %1036 = dma.vmem_to_hbm [thread:$0]  %s1031_s17, 256, %s1694_s7, [#allocation3], %s1314_s15, %s1314_s15, %s1315_s18  }
 0x480   :  { %1306 = dma.done.wait [#allocation3], 256  }
 0x481   :  { %1307 = vsyncadd [#allocation3], 4294967040 }
 0x482   :  { %1040 = vsyncpa [#allocation3], 1 }

</bundles_post_ra>
